<compile_context>
chip_gen: v7x
topology: tpu7x:2x2x1
jax: 0.10.0
libtpu: 0.0.40
codegen_flags: <defaults>
</compile_context>

<pallas_src>
import jax
import jax.numpy as jnp
from jax import lax
from jax.experimental import pallas as pl
from jax.experimental.pallas import tpu as pltpu

embedding_size = 10
hidden_size = 8
input_size = 4          # vocab size (and range of token ids)
num_class = 4
num_layers = 2          # hard-wired: two stacked RNN layers below


def rnn_kernel(x_ref, emb_ih0_ref,
               w_hh0_ref, w_ih1_ref, w_hh1_ref, b1_ref,
               w_fc_ref, b_fc_ref,
               out_ref, h_all_ref):
    B, T = x_ref.shape
    V, H = emb_ih0_ref.shape

    emb_ih0 = emb_ih0_ref[...]                                    # (V, H) pre-fused
    w_hh0 = w_hh0_ref[...]                                        # (H, H)
    w_ih1 = w_ih1_ref[...]                                        # (H, H)
    w_hh1 = w_hh1_ref[...]                                        # (H, H)
    b1 = b1_ref[...]                                              # (1, H)

    # ---- hoisted input projection for ALL timesteps (one MXU push) -------
    # onehot rows sum to 1, so b0 is already folded into emb_ih0.
    lane_iota = lax.broadcasted_iota(jnp.int32, (B, V), 1)        # (B, V)
    onehot_all = jnp.concatenate(
        [(x_ref[:, pl.ds(t, 1)] == lane_iota).astype(jnp.float32)
         for t in range(T)], axis=0)                              # (T*B, V), t-major
    x0_all = jnp.dot(onehot_all, emb_ih0,
                     preferred_element_type=jnp.float32)          # (T*B, H)

    # ---- recurrence: only the truly dependent dots stay per step ---------
    h0 = jnp.zeros((B, H), jnp.float32)
    h1 = jnp.zeros((B, H), jnp.float32)
    for t in range(T):                       # static T -> fully unrolled
        # layer-1 recurrent term depends only on the previous h1 -> off-chain
        h1_rec = jnp.dot(h1, w_hh1, preferred_element_type=jnp.float32) + b1
        # layer 0: h0 = tanh(x W_ih0 + b0 + h0 W_hh0)
        h0 = jnp.tanh(x0_all[t * B:(t + 1) * B, :]
                      + jnp.dot(h0, w_hh0, preferred_element_type=jnp.float32))
        # layer 1 (un-fused, no per-step concat on the chain)
        h1 = jnp.tanh(jnp.dot(h0, w_ih1, preferred_element_type=jnp.float32)
                      + h1_rec)
        # stash h1 rows at their final batch-major positions (row b*T + t);
        # these stores do not feed the recurrence, so they overlap freely.
        for b in range(B):
            h_all_ref[pl.ds(b * T + t, 1), :] = h1[b:b + 1, :]

    # ---- deferred FC epilogue: one matmul, one store ----------------------
    # rows already ordered b*T + t, matching torch's batch_first view(-1, C).
    out_ref[...] = (jnp.dot(h_all_ref[...], w_fc_ref[...],
                            preferred_element_type=jnp.float32)
                    + b_fc_ref[...])                              # (B*T, C)


def fuse_params(params):
    """One-time parameter transform (amortized over all forward calls)."""
    return {
        "emb_ih0": params["emb"] @ params["w_ih0"] + params["b0"],  # (V, H)
        "w_hh0": params["w_hh0"],
        "w_ih1": params["w_ih1"],
        "w_hh1": params["w_hh1"],
        "b1": params["b1"],
        "w_fc": params["w_fc"],
        "b_fc": params["b_fc"],
    }


def model_forward(x, fused):
    B, T = x.shape
    vmem = pltpu.MemorySpace.VMEM
    return pl.pallas_call(
        rnn_kernel,
        out_shape=jax.ShapeDtypeStruct((B * T, num_class), jnp.float32),
        in_specs=[pl.BlockSpec(memory_space=vmem)] * 8,
        out_specs=pl.BlockSpec(memory_space=vmem),
        scratch_shapes=[pltpu.VMEM((B * T, hidden_size), jnp.float32)],
        cost_estimate=pl.CostEstimate(flops=12_000, transcendentals=256,
                                      bytes_accessed=2_048),
    )(x,
      fused["emb_ih0"],
      fused["w_hh0"], fused["w_ih1"], fused["w_hh1"], fused["b1"],
      fused["w_fc"], fused["b_fc"])


def reference_forward(x, params):
    """Pure-JAX reference matching torch semantics (for verification)."""
    B, T = x.shape
    emb = params["emb"][x]                                        # (B, T, E)
    h0 = jnp.zeros((B, hidden_size), jnp.float32)
    h1 = jnp.zeros((B, hidden_size), jnp.float32)
    outs = []
    for t in range(T):
        h0 = jnp.tanh(emb[:, t] @ params["w_ih0"] + h0 @ params["w_hh0"] + params["b0"])
        h1 = jnp.tanh(h0 @ params["w_ih1"] + h1 @ params["w_hh1"] + params["b1"])
        outs.append(h1 @ params["w_fc"] + params["b_fc"])
    return jnp.stack(outs, axis=1).reshape(-1, num_class)


def init_params(key):
    ks = jax.random.split(key, 10)
    u = lambda k, shape, s: jax.random.uniform(k, shape, jnp.float32, -s, s)
    s_rnn = 1.0 / jnp.sqrt(hidden_size)
    s_fc = 1.0 / jnp.sqrt(hidden_size)
    return {
        "emb":   jax.random.normal(ks[0], (input_size, embedding_size), jnp.float32),
        # layer 0: input = embedding_size
        "w_ih0": u(ks[1], (embedding_size, hidden_size), s_rnn),
        "w_hh0": u(ks[2], (hidden_size, hidden_size), s_rnn),
        "b0":    u(ks[3], (1, hidden_size), s_rnn),   # = b_ih + b_hh folded together
        # layer 1: input = hidden_size
        "w_ih1": u(ks[4], (hidden_size, hidden_size), s_rnn),
        "w_hh1": u(ks[5], (hidden_size, hidden_size), s_rnn),
        "b1":    u(ks[6], (1, hidden_size), s_rnn),
        # fc
        "w_fc":  u(ks[7], (hidden_size, num_class), s_fc),
        "b_fc":  u(ks[8], (1, num_class), s_fc),
    }


if __name__ == "__main__":
    key = jax.random.PRNGKey(0)
    pkey, xkey = jax.random.split(key)
    params = init_params(pkey)
    fused = jax.tree_util.tree_map(jax.block_until_ready, fuse_params(params))

    B, T = 2, 8
    x = jax.random.randint(xkey, (B, T), 0, input_size, dtype=jnp.int32)

    out = jax.block_until_ready(model_forward(x, fused))
    ref = jax.block_until_ready(reference_forward(x, params))

    assert out.shape == (B * T, num_class), out.shape
    assert jnp.allclose(out, ref, rtol=1e-4, atol=1e-4), (out, ref)
    print("KERNEL_OK")
</pallas_src>

<mosaic_0001>
module attributes {stable_mosaic.version = 11 : i64} {
  func.func @rnn_kernel(%arg0: memref<2x8xi32, #tpu.memory_space<vmem>>, %arg1: memref<4x8xf32, #tpu.memory_space<vmem>>, %arg2: memref<8x8xf32, #tpu.memory_space<vmem>>, %arg3: memref<8x8xf32, #tpu.memory_space<vmem>>, %arg4: memref<8x8xf32, #tpu.memory_space<vmem>>, %arg5: memref<1x8xf32, #tpu.memory_space<vmem>>, %arg6: memref<8x4xf32, #tpu.memory_space<vmem>>, %arg7: memref<1x4xf32, #tpu.memory_space<vmem>>, %arg8: memref<16x4xf32, #tpu.memory_space<vmem>>, %arg9: memref<16x8xf32, #tpu.memory_space<vmem>>) attributes {dimension_semantics = [], scalar_prefetch = 0 : i64, scratch_operands = 1 : i64, tpu.core_type = #tpu.core_type<tc>} {
    %c0 = arith.constant 0 : index
    %c0_0 = arith.constant 0 : index
    %0 = vector.load %arg1[%c0, %c0_0] : memref<4x8xf32, #tpu.memory_space<vmem>>, vector<4x8xf32>
    %c0_1 = arith.constant 0 : index
    %c0_2 = arith.constant 0 : index
    %1 = vector.load %arg2[%c0_1, %c0_2] : memref<8x8xf32, #tpu.memory_space<vmem>>, vector<8x8xf32>
    %c0_3 = arith.constant 0 : index
    %c0_4 = arith.constant 0 : index
    %2 = vector.load %arg3[%c0_3, %c0_4] : memref<8x8xf32, #tpu.memory_space<vmem>>, vector<8x8xf32>
    %c0_5 = arith.constant 0 : index
    %c0_6 = arith.constant 0 : index
    %3 = vector.load %arg4[%c0_5, %c0_6] : memref<8x8xf32, #tpu.memory_space<vmem>>, vector<8x8xf32>
    %c0_7 = arith.constant 0 : index
    %c0_8 = arith.constant 0 : index
    %4 = vector.load %arg5[%c0_7, %c0_8] : memref<1x8xf32, #tpu.memory_space<vmem>>, vector<1x8xf32>
    %5 = tpu.iota {dimensions = array<i32: 1>} : vector<2x4xi32>
    %c0_9 = arith.constant 0 : index
    %c0_10 = arith.constant 0 : index
    %6 = vector.load %arg0[%c0_9, %c0_10] : memref<2x8xi32, #tpu.memory_space<vmem>>, vector<2x1xi32>
    %7 = vector.broadcast %6 : vector<2x1xi32> to vector<2x4xi32>
    %8 = arith.cmpi eq, %7, %5 : vector<2x4xi32>
    %9 = arith.extui %8 : vector<2x4xi1> to vector<2x4xi32>
    %10 = arith.sitofp %9 : vector<2x4xi32> to vector<2x4xf32>
    %c0_11 = arith.constant 0 : index
    %c1 = arith.constant 1 : index
    %11 = vector.load %arg0[%c0_11, %c1] : memref<2x8xi32, #tpu.memory_space<vmem>>, vector<2x1xi32>
    %12 = vector.broadcast %11 : vector<2x1xi32> to vector<2x4xi32>
    %13 = arith.cmpi eq, %12, %5 : vector<2x4xi32>
    %14 = arith.extui %13 : vector<2x4xi1> to vector<2x4xi32>
    %15 = arith.sitofp %14 : vector<2x4xi32> to vector<2x4xf32>
    %c0_12 = arith.constant 0 : index
    %c2 = arith.constant 2 : index
    %16 = vector.load %arg0[%c0_12, %c2] : memref<2x8xi32, #tpu.memory_space<vmem>>, vector<2x1xi32>
    %17 = vector.broadcast %16 : vector<2x1xi32> to vector<2x4xi32>
    %18 = arith.cmpi eq, %17, %5 : vector<2x4xi32>
    %19 = arith.extui %18 : vector<2x4xi1> to vector<2x4xi32>
    %20 = arith.sitofp %19 : vector<2x4xi32> to vector<2x4xf32>
    %c0_13 = arith.constant 0 : index
    %c3 = arith.constant 3 : index
    %21 = vector.load %arg0[%c0_13, %c3] : memref<2x8xi32, #tpu.memory_space<vmem>>, vector<2x1xi32>
    %22 = vector.broadcast %21 : vector<2x1xi32> to vector<2x4xi32>
    %23 = arith.cmpi eq, %22, %5 : vector<2x4xi32>
    %24 = arith.extui %23 : vector<2x4xi1> to vector<2x4xi32>
    %25 = arith.sitofp %24 : vector<2x4xi32> to vector<2x4xf32>
    %c0_14 = arith.constant 0 : index
    %c4 = arith.constant 4 : index
    %26 = vector.load %arg0[%c0_14, %c4] : memref<2x8xi32, #tpu.memory_space<vmem>>, vector<2x1xi32>
    %27 = vector.broadcast %26 : vector<2x1xi32> to vector<2x4xi32>
    %28 = arith.cmpi eq, %27, %5 : vector<2x4xi32>
    %29 = arith.extui %28 : vector<2x4xi1> to vector<2x4xi32>
    %30 = arith.sitofp %29 : vector<2x4xi32> to vector<2x4xf32>
    %c0_15 = arith.constant 0 : index
    %c5 = arith.constant 5 : index
    %31 = vector.load %arg0[%c0_15, %c5] : memref<2x8xi32, #tpu.memory_space<vmem>>, vector<2x1xi32>
    %32 = vector.broadcast %31 : vector<2x1xi32> to vector<2x4xi32>
    %33 = arith.cmpi eq, %32, %5 : vector<2x4xi32>
    %34 = arith.extui %33 : vector<2x4xi1> to vector<2x4xi32>
    %35 = arith.sitofp %34 : vector<2x4xi32> to vector<2x4xf32>
    %c0_16 = arith.constant 0 : index
    %c6 = arith.constant 6 : index
    %36 = vector.load %arg0[%c0_16, %c6] : memref<2x8xi32, #tpu.memory_space<vmem>>, vector<2x1xi32>
    %37 = vector.broadcast %36 : vector<2x1xi32> to vector<2x4xi32>
    %38 = arith.cmpi eq, %37, %5 : vector<2x4xi32>
    %39 = arith.extui %38 : vector<2x4xi1> to vector<2x4xi32>
    %40 = arith.sitofp %39 : vector<2x4xi32> to vector<2x4xf32>
    %c0_17 = arith.constant 0 : index
    %c7 = arith.constant 7 : index
    %41 = vector.load %arg0[%c0_17, %c7] : memref<2x8xi32, #tpu.memory_space<vmem>>, vector<2x1xi32>
    %42 = vector.broadcast %41 : vector<2x1xi32> to vector<2x4xi32>
    %43 = arith.cmpi eq, %42, %5 : vector<2x4xi32>
    %44 = arith.extui %43 : vector<2x4xi1> to vector<2x4xi32>
    %45 = arith.sitofp %44 : vector<2x4xi32> to vector<2x4xf32>
    %46 = tpu.concatenate %10, %15, %20, %25, %30, %35, %40, %45 in 0 : vector<2x4xf32>, vector<2x4xf32>, vector<2x4xf32>, vector<2x4xf32>, vector<2x4xf32>, vector<2x4xf32>, vector<2x4xf32>, vector<2x4xf32> -> vector<16x4xf32>
    %cst = arith.constant dense<0.000000e+00> : vector<16x8xf32>
    %47 = tpu.matmul %46, %0, %cst {dimension_numbers = #tpu.dot_dimension_numbers<[1], [0], [0], [1], [0, 0, 1, 1], [], []>} : vector<16x4xf32>, vector<4x8xf32>, vector<16x8xf32> -> vector<16x8xf32>
    %cst_18 = arith.constant 0.000000e+00 : f32
    %48 = vector.broadcast %cst_18 : f32 to vector<2x8xf32>
    %cst_19 = arith.constant 0.000000e+00 : f32
    %49 = vector.broadcast %cst_19 : f32 to vector<2x8xf32>
    %cst_20 = arith.constant dense<0.000000e+00> : vector<2x8xf32>
    %50 = tpu.matmul %49, %3, %cst_20 {dimension_numbers = #tpu.dot_dimension_numbers<[1], [0], [0], [1], [0, 0, 1, 1], [], []>} : vector<2x8xf32>, vector<8x8xf32>, vector<2x8xf32> -> vector<2x8xf32>
    %51 = vector.broadcast %4 : vector<1x8xf32> to vector<2x8xf32>
    %52 = arith.addf %50, %51 : vector<2x8xf32>
    %53 = vector.extract_strided_slice %47 {offsets = [0, 0], sizes = [2, 8], strides = [1, 1]} : vector<16x8xf32> to vector<2x8xf32>
    %cst_21 = arith.constant dense<0.000000e+00> : vector<2x8xf32>
    %54 = tpu.matmul %48, %1, %cst_21 {dimension_numbers = #tpu.dot_dimension_numbers<[1], [0], [0], [1], [0, 0, 1, 1], [], []>} : vector<2x8xf32>, vector<8x8xf32>, vector<2x8xf32> -> vector<2x8xf32>
    %55 = arith.addf %53, %54 : vector<2x8xf32>
    %56 = math.tanh %55 : vector<2x8xf32>
    %cst_22 = arith.constant dense<0.000000e+00> : vector<2x8xf32>
    %57 = tpu.matmul %56, %2, %cst_22 {dimension_numbers = #tpu.dot_dimension_numbers<[1], [0], [0], [1], [0, 0, 1, 1], [], []>} : vector<2x8xf32>, vector<8x8xf32>, vector<2x8xf32> -> vector<2x8xf32>
    %58 = arith.addf %57, %52 : vector<2x8xf32>
    %59 = math.tanh %58 : vector<2x8xf32>
    %60 = vector.extract_strided_slice %59 {offsets = [0, 0], sizes = [1, 8], strides = [1, 1]} : vector<2x8xf32> to vector<1x8xf32>
    %c0_23 = arith.constant 0 : index
    %c0_24 = arith.constant 0 : index
    %61 = vector.load %arg9[%c0_23, %c0_24] : memref<16x8xf32, #tpu.memory_space<vmem>>, vector<1x8xf32>
    tpu.vector_store %arg9[%c0_23, %c0_24], %60 {strides = array<i32>} : memref<16x8xf32, #tpu.memory_space<vmem>>, vector<1x8xf32>,
    %62 = vector.extract_strided_slice %59 {offsets = [1, 0], sizes = [1, 8], strides = [1, 1]} : vector<2x8xf32> to vector<1x8xf32>
    %c8 = arith.constant 8 : index
    %c0_25 = arith.constant 0 : index
    %63 = vector.load %arg9[%c8, %c0_25] : memref<16x8xf32, #tpu.memory_space<vmem>>, vector<1x8xf32>
    tpu.vector_store %arg9[%c8, %c0_25], %62 {strides = array<i32>} : memref<16x8xf32, #tpu.memory_space<vmem>>, vector<1x8xf32>,
    %cst_26 = arith.constant dense<0.000000e+00> : vector<2x8xf32>
    %64 = tpu.matmul %59, %3, %cst_26 {dimension_numbers = #tpu.dot_dimension_numbers<[1], [0], [0], [1], [0, 0, 1, 1], [], []>} : vector<2x8xf32>, vector<8x8xf32>, vector<2x8xf32> -> vector<2x8xf32>
    %65 = vector.broadcast %4 : vector<1x8xf32> to vector<2x8xf32>
    %66 = arith.addf %64, %65 : vector<2x8xf32>
    %67 = vector.extract_strided_slice %47 {offsets = [2, 0], sizes = [2, 8], strides = [1, 1]} : vector<16x8xf32> to vector<2x8xf32>
    %cst_27 = arith.constant dense<0.000000e+00> : vector<2x8xf32>
    %68 = tpu.matmul %56, %1, %cst_27 {dimension_numbers = #tpu.dot_dimension_numbers<[1], [0], [0], [1], [0, 0, 1, 1], [], []>} : vector<2x8xf32>, vector<8x8xf32>, vector<2x8xf32> -> vector<2x8xf32>
    %69 = arith.addf %67, %68 : vector<2x8xf32>
    %70 = math.tanh %69 : vector<2x8xf32>
    %cst_28 = arith.constant dense<0.000000e+00> : vector<2x8xf32>
    %71 = tpu.matmul %70, %2, %cst_28 {dimension_numbers = #tpu.dot_dimension_numbers<[1], [0], [0], [1], [0, 0, 1, 1], [], []>} : vector<2x8xf32>, vector<8x8xf32>, vector<2x8xf32> -> vector<2x8xf32>
    %72 = arith.addf %71, %66 : vector<2x8xf32>
    %73 = math.tanh %72 : vector<2x8xf32>
    %74 = vector.extract_strided_slice %73 {offsets = [0, 0], sizes = [1, 8], strides = [1, 1]} : vector<2x8xf32> to vector<1x8xf32>
    %c1_29 = arith.constant 1 : index
    %c0_30 = arith.constant 0 : index
    %75 = vector.load %arg9[%c1_29, %c0_30] : memref<16x8xf32, #tpu.memory_space<vmem>>, vector<1x8xf32>
    tpu.vector_store %arg9[%c1_29, %c0_30], %74 {strides = array<i32>} : memref<16x8xf32, #tpu.memory_space<vmem>>, vector<1x8xf32>,
    %76 = vector.extract_strided_slice %73 {offsets = [1, 0], sizes = [1, 8], strides = [1, 1]} : vector<2x8xf32> to vector<1x8xf32>
    %c9 = arith.constant 9 : index
    %c0_31 = arith.constant 0 : index
    %77 = vector.load %arg9[%c9, %c0_31] : memref<16x8xf32, #tpu.memory_space<vmem>>, vector<1x8xf32>
    tpu.vector_store %arg9[%c9, %c0_31], %76 {strides = array<i32>} : memref<16x8xf32, #tpu.memory_space<vmem>>, vector<1x8xf32>,
    %cst_32 = arith.constant dense<0.000000e+00> : vector<2x8xf32>
    %78 = tpu.matmul %73, %3, %cst_32 {dimension_numbers = #tpu.dot_dimension_numbers<[1], [0], [0], [1], [0, 0, 1, 1], [], []>} : vector<2x8xf32>, vector<8x8xf32>, vector<2x8xf32> -> vector<2x8xf32>
    %79 = vector.broadcast %4 : vector<1x8xf32> to vector<2x8xf32>
    %80 = arith.addf %78, %79 : vector<2x8xf32>
    %81 = vector.extract_strided_slice %47 {offsets = [4, 0], sizes = [2, 8], strides = [1, 1]} : vector<16x8xf32> to vector<2x8xf32>
    %cst_33 = arith.constant dense<0.000000e+00> : vector<2x8xf32>
    %82 = tpu.matmul %70, %1, %cst_33 {dimension_numbers = #tpu.dot_dimension_numbers<[1], [0], [0], [1], [0, 0, 1, 1], [], []>} : vector<2x8xf32>, vector<8x8xf32>, vector<2x8xf32> -> vector<2x8xf32>
    %83 = arith.addf %81, %82 : vector<2x8xf32>
    %84 = math.tanh %83 : vector<2x8xf32>
    %cst_34 = arith.constant dense<0.000000e+00> : vector<2x8xf32>
    %85 = tpu.matmul %84, %2, %cst_34 {dimension_numbers = #tpu.dot_dimension_numbers<[1], [0], [0], [1], [0, 0, 1, 1], [], []>} : vector<2x8xf32>, vector<8x8xf32>, vector<2x8xf32> -> vector<2x8xf32>
    %86 = arith.addf %85, %80 : vector<2x8xf32>
    %87 = math.tanh %86 : vector<2x8xf32>
    %88 = vector.extract_strided_slice %87 {offsets = [0, 0], sizes = [1, 8], strides = [1, 1]} : vector<2x8xf32> to vector<1x8xf32>
    %c2_35 = arith.constant 2 : index
    %c0_36 = arith.constant 0 : index
    %89 = vector.load %arg9[%c2_35, %c0_36] : memref<16x8xf32, #tpu.memory_space<vmem>>, vector<1x8xf32>
    tpu.vector_store %arg9[%c2_35, %c0_36], %88 {strides = array<i32>} : memref<16x8xf32, #tpu.memory_space<vmem>>, vector<1x8xf32>,
    %90 = vector.extract_strided_slice %87 {offsets = [1, 0], sizes = [1, 8], strides = [1, 1]} : vector<2x8xf32> to vector<1x8xf32>
    %c10 = arith.constant 10 : index
    %c0_37 = arith.constant 0 : index
    %91 = vector.load %arg9[%c10, %c0_37] : memref<16x8xf32, #tpu.memory_space<vmem>>, vector<1x8xf32>
    tpu.vector_store %arg9[%c10, %c0_37], %90 {strides = array<i32>} : memref<16x8xf32, #tpu.memory_space<vmem>>, vector<1x8xf32>,
    %cst_38 = arith.constant dense<0.000000e+00> : vector<2x8xf32>
    %92 = tpu.matmul %87, %3, %cst_38 {dimension_numbers = #tpu.dot_dimension_numbers<[1], [0], [0], [1], [0, 0, 1, 1], [], []>} : vector<2x8xf32>, vector<8x8xf32>, vector<2x8xf32> -> vector<2x8xf32>
    %93 = vector.broadcast %4 : vector<1x8xf32> to vector<2x8xf32>
    %94 = arith.addf %92, %93 : vector<2x8xf32>
    %95 = vector.extract_strided_slice %47 {offsets = [6, 0], sizes = [2, 8], strides = [1, 1]} : vector<16x8xf32> to vector<2x8xf32>
    %cst_39 = arith.constant dense<0.000000e+00> : vector<2x8xf32>
    %96 = tpu.matmul %84, %1, %cst_39 {dimension_numbers = #tpu.dot_dimension_numbers<[1], [0], [0], [1], [0, 0, 1, 1], [], []>} : vector<2x8xf32>, vector<8x8xf32>, vector<2x8xf32> -> vector<2x8xf32>
    %97 = arith.addf %95, %96 : vector<2x8xf32>
    %98 = math.tanh %97 : vector<2x8xf32>
    %cst_40 = arith.constant dense<0.000000e+00> : vector<2x8xf32>
    %99 = tpu.matmul %98, %2, %cst_40 {dimension_numbers = #tpu.dot_dimension_numbers<[1], [0], [0], [1], [0, 0, 1, 1], [], []>} : vector<2x8xf32>, vector<8x8xf32>, vector<2x8xf32> -> vector<2x8xf32>
    %100 = arith.addf %99, %94 : vector<2x8xf32>
    %101 = math.tanh %100 : vector<2x8xf32>
    %102 = vector.extract_strided_slice %101 {offsets = [0, 0], sizes = [1, 8], strides = [1, 1]} : vector<2x8xf32> to vector<1x8xf32>
    %c3_41 = arith.constant 3 : index
    %c0_42 = arith.constant 0 : index
    %103 = vector.load %arg9[%c3_41, %c0_42] : memref<16x8xf32, #tpu.memory_space<vmem>>, vector<1x8xf32>
    tpu.vector_store %arg9[%c3_41, %c0_42], %102 {strides = array<i32>} : memref<16x8xf32, #tpu.memory_space<vmem>>, vector<1x8xf32>,
    %104 = vector.extract_strided_slice %101 {offsets = [1, 0], sizes = [1, 8], strides = [1, 1]} : vector<2x8xf32> to vector<1x8xf32>
    %c11 = arith.constant 11 : index
    %c0_43 = arith.constant 0 : index
    %105 = vector.load %arg9[%c11, %c0_43] : memref<16x8xf32, #tpu.memory_space<vmem>>, vector<1x8xf32>
    tpu.vector_store %arg9[%c11, %c0_43], %104 {strides = array<i32>} : memref<16x8xf32, #tpu.memory_space<vmem>>, vector<1x8xf32>,
    %cst_44 = arith.constant dense<0.000000e+00> : vector<2x8xf32>
    %106 = tpu.matmul %101, %3, %cst_44 {dimension_numbers = #tpu.dot_dimension_numbers<[1], [0], [0], [1], [0, 0, 1, 1], [], []>} : vector<2x8xf32>, vector<8x8xf32>, vector<2x8xf32> -> vector<2x8xf32>
    %107 = vector.broadcast %4 : vector<1x8xf32> to vector<2x8xf32>
    %108 = arith.addf %106, %107 : vector<2x8xf32>
    %109 = vector.extract_strided_slice %47 {offsets = [8, 0], sizes = [2, 8], strides = [1, 1]} : vector<16x8xf32> to vector<2x8xf32>
    %cst_45 = arith.constant dense<0.000000e+00> : vector<2x8xf32>
    %110 = tpu.matmul %98, %1, %cst_45 {dimension_numbers = #tpu.dot_dimension_numbers<[1], [0], [0], [1], [0, 0, 1, 1], [], []>} : vector<2x8xf32>, vector<8x8xf32>, vector<2x8xf32> -> vector<2x8xf32>
    %111 = arith.addf %109, %110 : vector<2x8xf32>
    %112 = math.tanh %111 : vector<2x8xf32>
    %cst_46 = arith.constant dense<0.000000e+00> : vector<2x8xf32>
    %113 = tpu.matmul %112, %2, %cst_46 {dimension_numbers = #tpu.dot_dimension_numbers<[1], [0], [0], [1], [0, 0, 1, 1], [], []>} : vector<2x8xf32>, vector<8x8xf32>, vector<2x8xf32> -> vector<2x8xf32>
    %114 = arith.addf %113, %108 : vector<2x8xf32>
    %115 = math.tanh %114 : vector<2x8xf32>
    %116 = vector.extract_strided_slice %115 {offsets = [0, 0], sizes = [1, 8], strides = [1, 1]} : vector<2x8xf32> to vector<1x8xf32>
    %c4_47 = arith.constant 4 : index
    %c0_48 = arith.constant 0 : index
    %117 = vector.load %arg9[%c4_47, %c0_48] : memref<16x8xf32, #tpu.memory_space<vmem>>, vector<1x8xf32>
    tpu.vector_store %arg9[%c4_47, %c0_48], %116 {strides = array<i32>} : memref<16x8xf32, #tpu.memory_space<vmem>>, vector<1x8xf32>,
    %118 = vector.extract_strided_slice %115 {offsets = [1, 0], sizes = [1, 8], strides = [1, 1]} : vector<2x8xf32> to vector<1x8xf32>
    %c12 = arith.constant 12 : index
    %c0_49 = arith.constant 0 : index
    %119 = vector.load %arg9[%c12, %c0_49] : memref<16x8xf32, #tpu.memory_space<vmem>>, vector<1x8xf32>
    tpu.vector_store %arg9[%c12, %c0_49], %118 {strides = array<i32>} : memref<16x8xf32, #tpu.memory_space<vmem>>, vector<1x8xf32>,
    %cst_50 = arith.constant dense<0.000000e+00> : vector<2x8xf32>
    %120 = tpu.matmul %115, %3, %cst_50 {dimension_numbers = #tpu.dot_dimension_numbers<[1], [0], [0], [1], [0, 0, 1, 1], [], []>} : vector<2x8xf32>, vector<8x8xf32>, vector<2x8xf32> -> vector<2x8xf32>
    %121 = vector.broadcast %4 : vector<1x8xf32> to vector<2x8xf32>
    %122 = arith.addf %120, %121 : vector<2x8xf32>
    %123 = vector.extract_strided_slice %47 {offsets = [10, 0], sizes = [2, 8], strides = [1, 1]} : vector<16x8xf32> to vector<2x8xf32>
    %cst_51 = arith.constant dense<0.000000e+00> : vector<2x8xf32>
    %124 = tpu.matmul %112, %1, %cst_51 {dimension_numbers = #tpu.dot_dimension_numbers<[1], [0], [0], [1], [0, 0, 1, 1], [], []>} : vector<2x8xf32>, vector<8x8xf32>, vector<2x8xf32> -> vector<2x8xf32>
    %125 = arith.addf %123, %124 : vector<2x8xf32>
    %126 = math.tanh %125 : vector<2x8xf32>
    %cst_52 = arith.constant dense<0.000000e+00> : vector<2x8xf32>
    %127 = tpu.matmul %126, %2, %cst_52 {dimension_numbers = #tpu.dot_dimension_numbers<[1], [0], [0], [1], [0, 0, 1, 1], [], []>} : vector<2x8xf32>, vector<8x8xf32>, vector<2x8xf32> -> vector<2x8xf32>
    %128 = arith.addf %127, %122 : vector<2x8xf32>
    %129 = math.tanh %128 : vector<2x8xf32>
    %130 = vector.extract_strided_slice %129 {offsets = [0, 0], sizes = [1, 8], strides = [1, 1]} : vector<2x8xf32> to vector<1x8xf32>
    %c5_53 = arith.constant 5 : index
    %c0_54 = arith.constant 0 : index
    %131 = vector.load %arg9[%c5_53, %c0_54] : memref<16x8xf32, #tpu.memory_space<vmem>>, vector<1x8xf32>
    tpu.vector_store %arg9[%c5_53, %c0_54], %130 {strides = array<i32>} : memref<16x8xf32, #tpu.memory_space<vmem>>, vector<1x8xf32>,
    %132 = vector.extract_strided_slice %129 {offsets = [1, 0], sizes = [1, 8], strides = [1, 1]} : vector<2x8xf32> to vector<1x8xf32>
    %c13 = arith.constant 13 : index
    %c0_55 = arith.constant 0 : index
    %133 = vector.load %arg9[%c13, %c0_55] : memref<16x8xf32, #tpu.memory_space<vmem>>, vector<1x8xf32>
    tpu.vector_store %arg9[%c13, %c0_55], %132 {strides = array<i32>} : memref<16x8xf32, #tpu.memory_space<vmem>>, vector<1x8xf32>,
    %cst_56 = arith.constant dense<0.000000e+00> : vector<2x8xf32>
    %134 = tpu.matmul %129, %3, %cst_56 {dimension_numbers = #tpu.dot_dimension_numbers<[1], [0], [0], [1], [0, 0, 1, 1], [], []>} : vector<2x8xf32>, vector<8x8xf32>, vector<2x8xf32> -> vector<2x8xf32>
    %135 = vector.broadcast %4 : vector<1x8xf32> to vector<2x8xf32>
    %136 = arith.addf %134, %135 : vector<2x8xf32>
    %137 = vector.extract_strided_slice %47 {offsets = [12, 0], sizes = [2, 8], strides = [1, 1]} : vector<16x8xf32> to vector<2x8xf32>
    %cst_57 = arith.constant dense<0.000000e+00> : vector<2x8xf32>
    %138 = tpu.matmul %126, %1, %cst_57 {dimension_numbers = #tpu.dot_dimension_numbers<[1], [0], [0], [1], [0, 0, 1, 1], [], []>} : vector<2x8xf32>, vector<8x8xf32>, vector<2x8xf32> -> vector<2x8xf32>
    %139 = arith.addf %137, %138 : vector<2x8xf32>
    %140 = math.tanh %139 : vector<2x8xf32>
    %cst_58 = arith.constant dense<0.000000e+00> : vector<2x8xf32>
    %141 = tpu.matmul %140, %2, %cst_58 {dimension_numbers = #tpu.dot_dimension_numbers<[1], [0], [0], [1], [0, 0, 1, 1], [], []>} : vector<2x8xf32>, vector<8x8xf32>, vector<2x8xf32> -> vector<2x8xf32>
    %142 = arith.addf %141, %136 : vector<2x8xf32>
    %143 = math.tanh %142 : vector<2x8xf32>
    %144 = vector.extract_strided_slice %143 {offsets = [0, 0], sizes = [1, 8], strides = [1, 1]} : vector<2x8xf32> to vector<1x8xf32>
    %c6_59 = arith.constant 6 : index
    %c0_60 = arith.constant 0 : index
    %145 = vector.load %arg9[%c6_59, %c0_60] : memref<16x8xf32, #tpu.memory_space<vmem>>, vector<1x8xf32>
    tpu.vector_store %arg9[%c6_59, %c0_60], %144 {strides = array<i32>} : memref<16x8xf32, #tpu.memory_space<vmem>>, vector<1x8xf32>,
    %146 = vector.extract_strided_slice %143 {offsets = [1, 0], sizes = [1, 8], strides = [1, 1]} : vector<2x8xf32> to vector<1x8xf32>
    %c14 = arith.constant 14 : index
    %c0_61 = arith.constant 0 : index
    %147 = vector.load %arg9[%c14, %c0_61] : memref<16x8xf32, #tpu.memory_space<vmem>>, vector<1x8xf32>
    tpu.vector_store %arg9[%c14, %c0_61], %146 {strides = array<i32>} : memref<16x8xf32, #tpu.memory_space<vmem>>, vector<1x8xf32>,
    %cst_62 = arith.constant dense<0.000000e+00> : vector<2x8xf32>
    %148 = tpu.matmul %143, %3, %cst_62 {dimension_numbers = #tpu.dot_dimension_numbers<[1], [0], [0], [1], [0, 0, 1, 1], [], []>} : vector<2x8xf32>, vector<8x8xf32>, vector<2x8xf32> -> vector<2x8xf32>
    %149 = vector.broadcast %4 : vector<1x8xf32> to vector<2x8xf32>
    %150 = arith.addf %148, %149 : vector<2x8xf32>
    %151 = vector.extract_strided_slice %47 {offsets = [14, 0], sizes = [2, 8], strides = [1, 1]} : vector<16x8xf32> to vector<2x8xf32>
    %cst_63 = arith.constant dense<0.000000e+00> : vector<2x8xf32>
    %152 = tpu.matmul %140, %1, %cst_63 {dimension_numbers = #tpu.dot_dimension_numbers<[1], [0], [0], [1], [0, 0, 1, 1], [], []>} : vector<2x8xf32>, vector<8x8xf32>, vector<2x8xf32> -> vector<2x8xf32>
    %153 = arith.addf %151, %152 : vector<2x8xf32>
    %154 = math.tanh %153 : vector<2x8xf32>
    %cst_64 = arith.constant dense<0.000000e+00> : vector<2x8xf32>
    %155 = tpu.matmul %154, %2, %cst_64 {dimension_numbers = #tpu.dot_dimension_numbers<[1], [0], [0], [1], [0, 0, 1, 1], [], []>} : vector<2x8xf32>, vector<8x8xf32>, vector<2x8xf32> -> vector<2x8xf32>
    %156 = arith.addf %155, %150 : vector<2x8xf32>
    %157 = math.tanh %156 : vector<2x8xf32>
    %158 = vector.extract_strided_slice %157 {offsets = [0, 0], sizes = [1, 8], strides = [1, 1]} : vector<2x8xf32> to vector<1x8xf32>
    %c7_65 = arith.constant 7 : index
    %c0_66 = arith.constant 0 : index
    %159 = vector.load %arg9[%c7_65, %c0_66] : memref<16x8xf32, #tpu.memory_space<vmem>>, vector<1x8xf32>
    tpu.vector_store %arg9[%c7_65, %c0_66], %158 {strides = array<i32>} : memref<16x8xf32, #tpu.memory_space<vmem>>, vector<1x8xf32>,
    %160 = vector.extract_strided_slice %157 {offsets = [1, 0], sizes = [1, 8], strides = [1, 1]} : vector<2x8xf32> to vector<1x8xf32>
    %c15 = arith.constant 15 : index
    %c0_67 = arith.constant 0 : index
    %161 = vector.load %arg9[%c15, %c0_67] : memref<16x8xf32, #tpu.memory_space<vmem>>, vector<1x8xf32>
    tpu.vector_store %arg9[%c15, %c0_67], %160 {strides = array<i32>} : memref<16x8xf32, #tpu.memory_space<vmem>>, vector<1x8xf32>,
    %c0_68 = arith.constant 0 : index
    %c0_69 = arith.constant 0 : index
    %162 = vector.load %arg9[%c0_68, %c0_69] : memref<16x8xf32, #tpu.memory_space<vmem>>, vector<16x8xf32>
    %c0_70 = arith.constant 0 : index
    %c0_71 = arith.constant 0 : index
    %163 = vector.load %arg6[%c0_70, %c0_71] : memref<8x4xf32, #tpu.memory_space<vmem>>, vector<8x4xf32>
    %cst_72 = arith.constant dense<0.000000e+00> : vector<16x4xf32>
    %164 = tpu.matmul %162, %163, %cst_72 {dimension_numbers = #tpu.dot_dimension_numbers<[1], [0], [0], [1], [0, 0, 1, 1], [], []>} : vector<16x8xf32>, vector<8x4xf32>, vector<16x4xf32> -> vector<16x4xf32>
    %c0_73 = arith.constant 0 : index
    %c0_74 = arith.constant 0 : index
    %165 = vector.load %arg7[%c0_73, %c0_74] : memref<1x4xf32, #tpu.memory_space<vmem>>, vector<1x4xf32>
    %166 = vector.broadcast %165 : vector<1x4xf32> to vector<16x4xf32>
    %167 = arith.addf %164, %166 : vector<16x4xf32>
    %c0_75 = arith.constant 0 : index
    %c0_76 = arith.constant 0 : index
    %168 = vector.load %arg8[%c0_75, %c0_76] : memref<16x4xf32, #tpu.memory_space<vmem>>, vector<16x4xf32>
    tpu.vector_store %arg8[%c0_75, %c0_76], %167 {strides = array<i32>} : memref<16x4xf32, #tpu.memory_space<vmem>>, vector<16x4xf32>,
    return
  }
}

</mosaic_0001>

<bundles_post_ra>
// kernel: tpu_custom_call.1
= control target key start
LH: loop header
LB: loop body
LE: loop exit
PB: predicated region body
PF: predicated region fallthrough
CT: control target
= control target key end

     0   :  { %13 = vsyncpa [#allocation4], 0  ;;  %s2758_s0 = inlined_call_operand.vmem [shape: s32[2,8], index: 0, kind: input, shape index: {}]   ;;  %s2759_s1 = inlined_call_operand.hbm [shape: f32[4,8], index: 1, kind: input, shape index: {}]   ;;  %s2760_s2 = inlined_call_operand.vmem [shape: f32[8,8], index: 2, kind: input, shape index: {}]   ;;  %s2761_s3 = inlined_call_operand.vmem [shape: f32[8,8], index: 3, kind: input, shape index: {}]   ;;  %s2762_s4 = inlined_call_operand.vmem [shape: f32[8,8], index: 4, kind: input, shape index: {}]   ;;  %s2763_s5 = inlined_call_operand.hbm [shape: f32[1,8], index: 5, kind: input, shape index: {}]   ;;  %s2764_s6 = inlined_call_operand.vmem [shape: f32[8,4], index: 6, kind: input, shape index: {}]   ;;  %s2765_s7 = inlined_call_operand.vmem [shape: f32[1,4], index: 7, kind: input, shape index: {}]   ;;  %s2766_s8 = inlined_call_operand.vmem [shape: f32[16,4], index: 8, kind: output, shape index: {}]  }
   0x1   :  { %14 = vsyncpa [#allocation6], 0  ;;  %s2467_s27 = smov [#allocation3]   ;;  %s2468_s29 = smov [#allocation5]  }
   0x2   :  { %s23_s28 = sshll.u32 %s2467_s27, 4  ;;  %s39_s30 = sshll.u32 %s2468_s29, 4  ;;  %s24_s28 = int_to_ptr.vmem [resolvable:$true] %s23_s28  ;;  %s40_s30 = int_to_ptr.vmem [resolvable:$true] %s39_s30 }
   0x3   :  { %s2419_s11 = scalar_lea.hbm %s2759_s1, 64 }
   0x4   :  { %p2420_p0 = scmp.ne.s32.totalorder %s2759_s1, %s2419_s11  ;;  %p2423_p1 = scmp.lt.u32.totalorder %s2419_s11, %s2759_s1 }
   0x6   :  { %p2425_p2 = pnand %p2423_p1, %p2420_p0 }
   0x8   :  { %2428 = shalt.err (!%p2425_p2)
}
   0x9   :  { %s2429_s16 = scalar_lea.vmem %s24_s28, 64  ;;  %p2434_p4 = scmp.lt.s32.totalorder %s24_s28, %s24_s28 }
   0xa   :  { %p2430_p3 = scmp.ne.s32.totalorder %s24_s28, %s2429_s16  ;;  %p2435_p5 = scmp.lt.s32.totalorder %s2429_s16, %s2429_s16 }
   0xc   :  { %p2436_p6 = por %p2435_p5, %p2434_p4 }
   0xe   :  { %p2437_p7 = pnand %p2436_p6, %p2430_p3 }
  0x10   :  { %2440 = shalt.err (!%p2437_p7)
}
  0x11   :  { %26 = dma.hbm_to_vmem [thread:$0]  %s2759_s1, 64, %s24_s28, [#allocation4]  }
  0x12   :  { %s2441_s21 = scalar_lea.hbm %s2763_s5, 16 }
  0x13   :  { %p2442_p8 = scmp.ne.s32.totalorder %s2763_s5, %s2441_s21  ;;  %p2445_p9 = scmp.lt.u32.totalorder %s2441_s21, %s2763_s5 }
  0x15   :  { %p2447_p10 = pnand %p2445_p9, %p2442_p8 }
  0x17   :  { %2450 = shalt.err (!%p2447_p10)
}
  0x18   :  { %s2451_s26 = scalar_lea.vmem %s40_s30, 16  ;;  %s2455_s27 = scalar_lea.vmem %s40_s30, 32 }
  0x19   :  { %p2452_p11 = scmp.ne.s32.totalorder %s40_s30, %s2451_s26  ;;  %p2456_p12 = scmp.lt.s32.totalorder %s40_s30, %s40_s30 }
  0x1a   :  { %p2457_p13 = scmp.lt.s32.totalorder %s2455_s27, %s2451_s26 }
  0x1c   :  { %p2458_p0 = por %p2457_p13, %p2456_p12 }
  0x1e   :  { %p2459_p1 = pnand %p2458_p0, %p2452_p11 }
  0x20   :  { %2462 = shalt.err (!%p2459_p1)
}
  0x21   :  { %42 = dma.hbm_to_vmem [thread:$0]  %s2763_s5, 16, %s40_s30, [#allocation6]  }
  0x22   :  { %2463 = dma.done.wait [#allocation4], 64  }
  0x23   :  { %2464 = vsyncadd [#allocation4], 4294967232 }
  0x24   :  { %2465 = dma.done.wait [#allocation6], 16  }
  0x25   :  { %2466 = vsyncadd [#allocation6], 4294967280  ;;  %v2469_v0 = vmov 5   ;;  %v2470_v1 = vmov 1   ;;  %v2471_v2 = vmov 0.0   ;;  %v2472_v4 = vmov 0  }
  0x26   :  { %2380 = vset.pattern.permute.xlu1 %v2469_v0  ;;  %2378 = vset.pattern.permute.xlu0 %v2470_v1  ;;  %v60_v3 = vld [vmem:[%s2758_s0] sm:$0x3]  ;;  %v2473_v5 = vmov 2   ;;  %v2474_v6 = vmov 3   ;;  %v2475_v7 = vmov 6   ;;  %v2476_v8 = vmov 4  }
  0x27   :  { %2217 = vmatprep.subr.mxu1 %v2471_v2  ;;  %92 = vperm.xlu1 %2380, %v60_v3   ;;  %v2477_v9 = vmov 7   ;;  %vm129_vm0 = vcmask 1043456   ;;  %v53_v10 = vld [vmem:[#allocation3] sm:$0xf]  ;;  %vm2478_vm1 = vmmov 0   ;;  %v58_v11 = vlaneseq  ;;  %v2574_v40 = vld [vmem:[%s2760_s2] sm:$0xff] }
  0x28   :  { %68 = vperm.xlu0 %2378, %v60_v3   ;;  %2212 = vmatprep.subr.msk.mxu0 %vm129_vm0, %v53_v10  ;;  %vm127_vm5 = vcmask 1041408   ;;  %vm131_vm7 = vcmask 1045504   ;;  %vm136_vm9 = vcmask 31744   ;;  %v2588_v42 = vld [vmem:[%s2762_s4] sm:$0xff]  ;;  %vm227_vm13 = vcmask 64512  }
  0x29   :  { %2213 = vmatpush3.msk.msra.mxu0 %vm129_vm0, %v53_v10  ;;  %2219 = vmatprep.mubr.msk.f32.mxu1 %vm2478_vm1, %v2471_v2  ;;  %v59_v12 = vand.u32 127, %v58_v11  ;;  %v2593_v43 = vld [vmem:[%s2761_s3] sm:$0xff]  ;;  %v2619_v50 = vld [vmem:[#allocation5] ss:$0 sm:$0xff]  ;;  %vm447_vm14 = vcmask 57344   ;;  %vm449_vm15 = vcmask 58369  }
  0x2a   :  { %2222 = vmatprep.subr.mxu0 %v2471_v2  ;;  %2218 = vmatpush3.msra.mxu1 %v2588_v42 }
  0x2b   :  { %2381 = vset.pattern.permute.xlu1 %v2472_v4  ;;  %2227 = vmatprep.subr.mxu1 %v2471_v2 }
  0x2c   :  { %2379 = vset.pattern.permute.xlu0 %v2473_v5  ;;  %62 = vperm.xlu1 %2381, %v60_v3  }
  0x2d   :  { %74 = vperm.xlu0 %2379, %v60_v3   ;;  %2220 = vmatmul.mubr.f32.vlgmr.msra.gmra.mrb[0].mxu1 %v2471_v2 }
  0x2e   :  { %2228 = vmatpush3.msra.mxu1 %v2593_v43  ;;  %2229 = vmatprep.mubr.msk.f32.mxu1 %vm2478_vm1, %v2471_v2 }
  0x2f   :  { %2237 = vmatprep.subr.mxu1 %v2471_v2 }
  0x30   :  { %2382 = vset.pattern.permute.xlu1 %v2474_v6 }
  0x31   :  { %2383 = vset.pattern.permute.xlu0 %v2475_v7  ;;  %80 = vperm.xlu1 %2382, %v60_v3  }
  0x32   :  { %98 = vperm.xlu0 %2383, %v60_v3  }
  0x35   :  { %2384 = vset.pattern.permute.xlu1 %v2476_v8 }
  0x36   :  { %2386 = vset.pattern.permute.xlu0 %v2477_v9  ;;  %86 = vperm.xlu1 %2384, %v60_v3  }
  0x3a   :  { %2385 = vset.pattern.permute.xlu1 %v2477_v9 }
  0x3b   :  { %104 = vperm.xlu1 %2385, %v60_v3  }
  0xa6   :  { %v93_v13 = vpop.permute.xlu1 %92 }
  0xa7   :  { %v69_v14 = vpop.permute.xlu0 %68  ;;  %vm94_vm8 = vcmp.eq.s32.totalorder %v93_v13, %v59_v12 }
  0xa8   :  { %vm70_vm2 = vcmp.eq.s32.totalorder %v69_v14, %v59_v12  ;;  %v2126_v30 = vsel %vm94_vm8, 1.0, %v2471_v2 }
  0xa9   :  { %v2122_v15 = vsel %vm70_vm2, 1.0, %v2471_v2  ;;  %v119_v33 = vrot.slane %v2126_v30, 6 }
  0xaa   :  { %v110_v18 = vrot.slane %v2122_v15, 6 }
  0xab   :  { %v63_v16 = vpop.permute.xlu1 %62 }
  0xac   :  { %v75_v17 = vpop.permute.xlu0 %74  ;;  %vm64_vm3 = vcmp.eq.s32.totalorder %v63_v16, %v59_v12 }
  0xad   :  { %vm76_vm4 = vcmp.eq.s32.totalorder %v75_v17, %v59_v12  ;;  %v2121_v20 = vsel %vm64_vm3, 1.0, %v2471_v2 }
  0xae   :  { %v2123_v19 = vsel %vm76_vm4, 1.0, %v2471_v2  ;;  %v128_v23 = vsel %vm127_vm5, %v2121_v20, %v110_v18 }
  0xaf   :  { %v113_v21 = vrot.slane %v2123_v19, 4 }
  0xb0   :  { %v81_v22 = vpop.permute.xlu1 %80 }
  0xb1   :  { %vm82_vm6 = vcmp.eq.s32.totalorder %v81_v22, %v59_v12  ;;  %v99_v24 = vpop.permute.xlu0 %98  ;;  %v130_v27 = vsel %vm129_vm0, %v128_v23, %v113_v21 }
  0xb2   :  { %v2124_v25 = vsel %vm82_vm6, 1.0, %v2471_v2  ;;  %vm100_vm10 = vcmp.eq.s32.totalorder %v99_v24, %v59_v12 }
  0xb3   :  { %v116_v26 = vrot.slane %v2124_v25, 2  ;;  %v2127_v31 = vsel %vm100_vm10, 1.0, %v2471_v2 }
  0xb4   :  { %v122_v34 = vrot.slane %v2127_v31, 4 }
  0xb5   :  { %v87_v28 = vpop.permute.xlu1 %86  ;;  %v132_v29 = vsel %vm131_vm7, %v130_v27, %v116_v26 }
  0xb6   :  { %vm88_vm11 = vcmp.eq.s32.totalorder %v87_v28, %v59_v12  ;;  %2214 = vmatprep.mubr.msk.f32.mxu0 %vm136_vm9, %v132_v29 }
  0xb7   :  { %v2125_v32 = vsel %vm88_vm11, 1.0, %v2471_v2 }
  0xb8   :  { %v133_v36 = vsel %vm127_vm5, %v2125_v32, %v119_v33 }
  0xb9   :  { %v134_v39 = vsel %vm129_vm0, %v133_v36, %v122_v34 }
  0xba   :  { %v105_v35 = vpop.permute.xlu1 %104 }
  0xbb   :  { %vm106_vm12 = vcmp.eq.s32.totalorder %v105_v35, %v59_v12 }
  0xbc   :  { %v2128_v37 = vsel %vm106_vm12, 1.0, %v2471_v2 }
  0xbd   :  { %v125_v38 = vrot.slane %v2128_v37, 2 }
  0xbf   :  { %v135_v41 = vsel %vm131_vm7, %v134_v39, %v125_v38 }
  0xc0   :  { %2215 = vmatmul.mubr.msk.f32.vlgmr.msra.gmra.mrb[0].mxu0 %vm136_vm9, %v135_v41 }
  0xc1   :  { %2223 = vmatpush3.msra.mxu0 %v2574_v40  ;;  %2224 = vmatprep.mubr.msk.f32.mxu0 %vm2478_vm1, %v2471_v2 }
  0xc2   :  { %2232 = vmatprep.subr.mxu0 %v2471_v2 }
  0xc4   :  { %2225 = vmatmul.mubr.f32.vlgmr.msra.gmra.mrb[2].mxu0 %v2471_v2 }
  0xc5   :  { %2234 = vmatprep.mubr.msk.f32.mxu0 %vm2478_vm1, %v2471_v2  ;;  %2233 = vmatpush3.msra.mxu0 %v2588_v42 }
  0xc6   :  { %2242 = vmatprep.subr.mxu0 %v2471_v2 }
 0x193   :  { %v2604_v44 = vpop.f32.mrb[0].mxu0 }
 0x194   :  { %v2606_v45 = vpop.f32.mrb[1].mxu0 }
 0x197   :  { %v367_v46 = vpop.f32.mrb[2].mxu0 }
 0x198   :  { %v371_v47 = vadd.f32 %v367_v46, %v2606_v45  ;;  %v2226_v48 = vpop.f32.mrb[3].mxu0 }
 0x19a   :  { %2387 = vtanh.f32 %v371_v47 }
 0x1a4   :  { %v2388_v49 = vpop.eup %2387 }
 0x1a5   :  { %2230 = vmatmul.mubr.msk.f32.vlgmr.msra.gmra.mrb[0].mxu1 %vm227_vm13, %v2388_v49 }
 0x1a6   :  { %2238 = vmatpush3.msra.mxu1 %v2574_v40  ;;  %2239 = vmatprep.mubr.msk.f32.mxu1 %vm2478_vm1, %v2471_v2 }
 0x1a7   :  { %2247 = vmatprep.subr.mxu1 %v2471_v2 }
 0x1a9   :  { %2240 = vmatmul.mubr.msk.f32.vlgmr.msra.gmra.mrb[2].mxu1 %vm227_vm13, %v2388_v49 }
 0x1aa   :  { %2248 = vmatpush3.msra.mxu1 %v2588_v42  ;;  %2249 = vmatprep.mubr.msk.f32.mxu1 %vm2478_vm1, %v2471_v2 }
 0x1ab   :  { %2257 = vmatprep.subr.mxu1 %v2471_v2 }
 0x278   :  { %v442_v51 = vpop.f32.mrb[0].mxu1 }
 0x279   :  { %v2342_v52 = vadd.f32 %v2619_v50, %v442_v51  ;;  %v2231_v53 = vpop.f32.mrb[1].mxu1 }
 0x27b   :  { %2389 = vtanh.f32 %v2342_v52 }
 0x27c   :  { %v590_v54 = vpop.f32.mrb[2].mxu1 }
 0x27d   :  { %v595_v55 = vrot.slane %v590_v54, 6  ;;  %v2241_v56 = vpop.f32.mrb[3].mxu1 }
 0x27f   :  { %v597_v57 = vadd.f32 %v595_v55, %v2606_v45 }
 0x281   :  { %2391 = vtanh.f32 %v597_v57 }
 0x285   :  { %v2390_v58 = vpop.eup %2389 }
 0x286   :  { %448 = vst.msk [vmem:[#allocation2] sm:$0x1] %vm447_vm14, %v2390_v58  ;;  %2235 = vmatmul.mubr.msk.f32.vlgmr.msra.gmra.mrb[4].mxu0 %vm227_vm13, %v2390_v58 }
 0x287   :  { %450 = vst.msk [vmem:[#allocation2 + $0x7] sm:$0x2] %vm449_vm15, %v2390_v58  ;;  %2243 = vmatpush3.msra.mxu0 %v2593_v43  ;;  %2244 = vmatprep.mubr.msk.f32.mxu0 %vm2478_vm1, %v2471_v2 }
 0x288   :  { %2252 = vmatprep.subr.mxu0 %v2471_v2 }
 0x28b   :  { %v2392_v59 = vpop.eup %2391 }
 0x28c   :  { %v600_v60 = vrot.slane %v2392_v59, 2 }
 0x28e   :  { %2245 = vmatmul.mubr.msk.f32.vlgmr.msra.gmra.mrb[4].mxu0 %vm227_vm13, %v600_v60 }
 0x28f   :  { %2253 = vmatpush3.msra.mxu0 %v2574_v40  ;;  %2254 = vmatprep.mubr.msk.f32.mxu0 %vm2478_vm1, %v2471_v2 }
 0x290   :  { %2262 = vmatprep.subr.mxu0 %v2471_v2 }
 0x292   :  { %2255 = vmatmul.mubr.msk.f32.vlgmr.msra.gmra.mrb[6].mxu0 %vm227_vm13, %v600_v60 }
 0x293   :  { %2263 = vmatpush3.msra.mxu0 %v2588_v42  ;;  %2264 = vmatprep.mubr.msk.f32.mxu0 %vm2478_vm1, %v2471_v2 }
 0x294   :  { %2272 = vmatprep.subr.mxu0 %v2471_v2 }
 0x361   :  { %v669_v61 = vpop.f32.mrb[4].mxu0 }
 0x362   :  { %v2343_v62 = vadd.f32 %v2619_v50, %v669_v61  ;;  %v2246_v63 = vpop.f32.mrb[5].mxu0 }
 0x363   :  { %v2155_v63 = vld [vmem:[%s2765_s7] ss:$0 sm:$0xff] }
 0x364   :  { %2393 = vtanh.f32 %v2343_v62 }
 0x365   :  { %v815_v0 = vpop.f32.mrb[6].mxu0 }
 0x366   :  { %v820_v1 = vrot.slane %v815_v0, 4  ;;  %v2256_v3 = vpop.f32.mrb[7].mxu0 }
 0x368   :  { %v822_v4 = vadd.f32 %v820_v1, %v2606_v45 }
 0x36a   :  { %2395 = vtanh.f32 %v822_v4 }
 0x36e   :  { %v2394_v5 = vpop.eup %2393 }
 0x36f   :  { %674 = vst.msk [vmem:[#allocation2 + $0x1] sm:$0x1] %vm447_vm14, %v2394_v5  ;;  %2250 = vmatmul.mubr.msk.f32.vlgmr.msra.gmra.mrb[4].mxu1 %vm227_vm13, %v2394_v5 }
 0x370   :  { %675 = vst.msk [vmem:[#allocation2 + $0x8] sm:$0x2] %vm449_vm15, %v2394_v5  ;;  %2258 = vmatpush3.msra.mxu1 %v2593_v43  ;;  %2259 = vmatprep.mubr.msk.f32.mxu1 %vm2478_vm1, %v2471_v2 }
 0x371   :  { %2267 = vmatprep.subr.mxu1 %v2471_v2 }
 0x374   :  { %v2396_v6 = vpop.eup %2395 }
 0x375   :  { %v825_v7 = vrot.slane %v2396_v6, 4 }
 0x377   :  { %2260 = vmatmul.mubr.msk.f32.vlgmr.msra.gmra.mrb[4].mxu1 %vm227_vm13, %v825_v7 }
 0x378   :  { %2268 = vmatpush3.msra.mxu1 %v2574_v40  ;;  %2269 = vmatprep.mubr.msk.f32.mxu1 %vm2478_vm1, %v2471_v2 }
 0x379   :  { %2277 = vmatprep.subr.mxu1 %v2471_v2 }
 0x37b   :  { %2270 = vmatmul.mubr.msk.f32.vlgmr.msra.gmra.mrb[6].mxu1 %vm227_vm13, %v825_v7 }
 0x37c   :  { %2278 = vmatpush3.msra.mxu1 %v2588_v42  ;;  %2279 = vmatprep.mubr.msk.f32.mxu1 %vm2478_vm1, %v2471_v2 }
 0x37d   :  { %2287 = vmatprep.subr.mxu1 %v2471_v2 }
 0x44a   :  { %v894_v8 = vpop.f32.mrb[4].mxu1 }
 0x44b   :  { %v2344_v9 = vadd.f32 %v2619_v50, %v894_v8  ;;  %v2261_v10 = vpop.f32.mrb[5].mxu1 }
 0x44d   :  { %2397 = vtanh.f32 %v2344_v9 }
 0x44e   :  { %v1040_v11 = vpop.f32.mrb[6].mxu1 }
 0x44f   :  { %v1045_v12 = vrot.slane %v1040_v11, 2  ;;  %v2271_v13 = vpop.f32.mrb[7].mxu1 }
 0x451   :  { %v1047_v14 = vadd.f32 %v1045_v12, %v2606_v45 }
 0x453   :  { %2399 = vtanh.f32 %v1047_v14 }
 0x457   :  { %v2398_v15 = vpop.eup %2397 }
 0x458   :  { %899 = vst.msk [vmem:[#allocation2 + $0x2] sm:$0x1] %vm447_vm14, %v2398_v15  ;;  %2265 = vmatmul.mubr.msk.f32.vlgmr.msra.gmra.mrb[8].mxu0 %vm227_vm13, %v2398_v15 }
 0x459   :  { %900 = vst.msk [vmem:[#allocation2 + $0x9] sm:$0x2] %vm449_vm15, %v2398_v15  ;;  %2273 = vmatpush3.msra.mxu0 %v2593_v43  ;;  %2274 = vmatprep.mubr.msk.f32.mxu0 %vm2478_vm1, %v2471_v2 }
 0x45a   :  { %2282 = vmatprep.subr.mxu0 %v2471_v2 }
 0x45d   :  { %v2400_v16 = vpop.eup %2399 }
 0x45e   :  { %v1050_v17 = vrot.slane %v2400_v16, 6 }
 0x460   :  { %2275 = vmatmul.mubr.msk.f32.vlgmr.msra.gmra.mrb[8].mxu0 %vm227_vm13, %v1050_v17 }
 0x461   :  { %2283 = vmatpush3.msra.mxu0 %v2574_v40  ;;  %2284 = vmatprep.mubr.msk.f32.mxu0 %vm2478_vm1, %v2471_v2 }
 0x462   :  { %2292 = vmatprep.subr.mxu0 %v2471_v2 }
 0x464   :  { %2285 = vmatmul.mubr.msk.f32.vlgmr.msra.gmra.mrb[10].mxu0 %vm227_vm13, %v1050_v17 }
 0x465   :  { %2293 = vmatpush3.msra.mxu0 %v2588_v42  ;;  %2294 = vmatprep.mubr.msk.f32.mxu0 %vm2478_vm1, %v2471_v2 }
 0x466   :  { %2302 = vmatprep.subr.mxu0 %v2471_v2 }
 0x533   :  { %v1119_v18 = vpop.f32.mrb[8].mxu0 }
 0x534   :  { %v2345_v19 = vadd.f32 %v2619_v50, %v1119_v18  ;;  %v2276_v20 = vpop.f32.mrb[9].mxu0 }
 0x536   :  { %2401 = vtanh.f32 %v2345_v19 }
 0x537   :  { %v1265_v21 = vpop.f32.mrb[10].mxu0 }
 0x538   :  { %v1269_v22 = vadd.f32 %v2604_v44, %v1265_v21  ;;  %v2286_v23 = vpop.f32.mrb[11].mxu0 }
 0x53a   :  { %2403 = vtanh.f32 %v1269_v22 }
 0x540   :  { %v2402_v24 = vpop.eup %2401 }
 0x541   :  { %1124 = vst.msk [vmem:[#allocation2 + $0x3] sm:$0x1] %vm447_vm14, %v2402_v24  ;;  %2280 = vmatmul.mubr.msk.f32.vlgmr.msra.gmra.mrb[8].mxu1 %vm227_vm13, %v2402_v24 }
 0x542   :  { %1125 = vst.msk [vmem:[#allocation2 + $0xa] sm:$0x2] %vm449_vm15, %v2402_v24  ;;  %2288 = vmatpush3.msra.mxu1 %v2593_v43  ;;  %2289 = vmatprep.mubr.msk.f32.mxu1 %vm2478_vm1, %v2471_v2 }
 0x543   :  { %2297 = vmatprep.subr.mxu1 %v2471_v2 }
 0x544   :  { %v2404_v25 = vpop.eup %2403 }
 0x549   :  { %2290 = vmatmul.mubr.msk.f32.vlgmr.msra.gmra.mrb[8].mxu1 %vm227_vm13, %v2404_v25 }
 0x54a   :  { %2298 = vmatpush3.msra.mxu1 %v2574_v40  ;;  %2299 = vmatprep.mubr.msk.f32.mxu1 %vm2478_vm1, %v2471_v2 }
 0x54b   :  { %2307 = vmatprep.subr.mxu1 %v2471_v2 }
 0x54d   :  { %2300 = vmatmul.mubr.msk.f32.vlgmr.msra.gmra.mrb[10].mxu1 %vm227_vm13, %v2404_v25 }
 0x54e   :  { %2308 = vmatpush3.msra.mxu1 %v2588_v42  ;;  %2309 = vmatprep.mubr.msk.f32.mxu1 %vm2478_vm1, %v2471_v2 }
 0x54f   :  { %2317 = vmatprep.subr.mxu1 %v2471_v2 }
 0x61c   :  { %v1340_v26 = vpop.f32.mrb[8].mxu1 }
 0x61d   :  { %v2346_v27 = vadd.f32 %v2619_v50, %v1340_v26  ;;  %v2291_v28 = vpop.f32.mrb[9].mxu1 }
 0x61f   :  { %2405 = vtanh.f32 %v2346_v27 }
 0x620   :  { %v1486_v29 = vpop.f32.mrb[10].mxu1 }
 0x621   :  { %v1491_v30 = vrot.slane %v1486_v29, 6  ;;  %v2301_v31 = vpop.f32.mrb[11].mxu1 }
 0x623   :  { %v1493_v32 = vadd.f32 %v2604_v44, %v1491_v30 }
 0x625   :  { %2407 = vtanh.f32 %v1493_v32 }
 0x629   :  { %v2406_v33 = vpop.eup %2405 }
 0x62a   :  { %1345 = vst.msk [vmem:[#allocation2 + $0x4] sm:$0x1] %vm447_vm14, %v2406_v33  ;;  %2295 = vmatmul.mubr.msk.f32.vlgmr.msra.gmra.mrb[12].mxu0 %vm227_vm13, %v2406_v33 }
 0x62b   :  { %1346 = vst.msk [vmem:[#allocation2 + $0xb] sm:$0x2] %vm449_vm15, %v2406_v33  ;;  %2303 = vmatpush3.msra.mxu0 %v2593_v43  ;;  %2304 = vmatprep.mubr.msk.f32.mxu0 %vm2478_vm1, %v2471_v2 }
 0x62c   :  { %2312 = vmatprep.subr.mxu0 %v2471_v2 }
 0x62f   :  { %v2408_v34 = vpop.eup %2407 }
 0x630   :  { %v1496_v35 = vrot.slane %v2408_v34, 2 }
 0x632   :  { %2305 = vmatmul.mubr.msk.f32.vlgmr.msra.gmra.mrb[12].mxu0 %vm227_vm13, %v1496_v35 }
 0x633   :  { %2313 = vmatpush3.msra.mxu0 %v2574_v40  ;;  %2314 = vmatprep.mubr.msk.f32.mxu0 %vm2478_vm1, %v2471_v2 }
 0x634   :  { %2322 = vmatprep.subr.mxu0 %v2471_v2 }
 0x636   :  { %2315 = vmatmul.mubr.msk.f32.vlgmr.msra.gmra.mrb[14].mxu0 %vm227_vm13, %v1496_v35 }
 0x637   :  { %2323 = vmatpush3.msra.mxu0 %v2588_v42  ;;  %2324 = vmatprep.mubr.msk.f32.mxu0 %vm2478_vm1, %v2471_v2 }
 0x638   :  { %2332 = vmatprep.subr.mxu0 %v2471_v2 }
 0x705   :  { %v1565_v36 = vpop.f32.mrb[12].mxu0 }
 0x706   :  { %v2347_v37 = vadd.f32 %v2619_v50, %v1565_v36  ;;  %v2306_v38 = vpop.f32.mrb[13].mxu0 }
 0x708   :  { %2409 = vtanh.f32 %v2347_v37 }
 0x709   :  { %v1711_v39 = vpop.f32.mrb[14].mxu0 }
 0x70a   :  { %v1716_v41 = vrot.slane %v1711_v39, 4  ;;  %v2316_v45 = vpop.f32.mrb[15].mxu0 }
 0x70c   :  { %v1718_v46 = vadd.f32 %v2604_v44, %v1716_v41 }
 0x70e   :  { %2411 = vtanh.f32 %v1718_v46 }
 0x712   :  { %v2410_v47 = vpop.eup %2409 }
 0x713   :  { %1570 = vst.msk [vmem:[#allocation2 + $0x5] sm:$0x1] %vm447_vm14, %v2410_v47  ;;  %2310 = vmatmul.mubr.msk.f32.vlgmr.msra.gmra.mrb[12].mxu1 %vm227_vm13, %v2410_v47 }
 0x714   :  { %1571 = vst.msk [vmem:[#allocation2 + $0xc] sm:$0x2] %vm449_vm15, %v2410_v47  ;;  %2318 = vmatpush3.msra.mxu1 %v2593_v43  ;;  %2319 = vmatprep.mubr.msk.f32.mxu1 %vm2478_vm1, %v2471_v2 }
 0x715   :  { %2327 = vmatprep.subr.mxu1 %v2471_v2 }
 0x718   :  { %v2412_v42 = vpop.eup %2411 }
 0x719   :  { %v1721_v48 = vrot.slane %v2412_v42, 4 }
 0x71b   :  { %2320 = vmatmul.mubr.msk.f32.vlgmr.msra.gmra.mrb[12].mxu1 %vm227_vm13, %v1721_v48 }
 0x71c   :  { %2328 = vmatpush3.msra.mxu1 %v2574_v40  ;;  %2329 = vmatprep.mubr.msk.f32.mxu1 %vm2478_vm1, %v2471_v2 }
 0x71f   :  { %2330 = vmatmul.mubr.msk.f32.vlgmr.msra.gmra.mrb[14].mxu1 %vm227_vm13, %v1721_v48 }
 0x7ee   :  { %v1790_v49 = vpop.f32.mrb[12].mxu1 }
 0x7ef   :  { %v2348_v51 = vadd.f32 %v2619_v50, %v1790_v49  ;;  %v2321_v52 = vpop.f32.mrb[13].mxu1 }
 0x7f1   :  { %2413 = vtanh.f32 %v2348_v51 }
 0x7f2   :  { %v1936_v53 = vpop.f32.mrb[14].mxu1 }
 0x7f3   :  { %v1941_v54 = vrot.slane %v1936_v53, 2  ;;  %v2331_v55 = vpop.f32.mrb[15].mxu1 }
 0x7f5   :  { %v1943_v56 = vadd.f32 %v2604_v44, %v1941_v54  ;;  %v2024_v44 = vld [vmem:[%s2764_s6] sm:$0xff] }
 0x7f6   :  { %2337 = vmatprep.subr.mxu1 %v2024_v44 }
 0x7f7   :  { %2415 = vtanh.f32 %v1943_v56  ;;  %2338 = vmatpush3.msra.mxu1 %v2024_v44 }
 0x7fb   :  { %v2414_v57 = vpop.eup %2413 }
 0x7fc   :  { %1795 = vst.msk [vmem:[#allocation2 + $0x6] sm:$0x1] %vm447_vm14, %v2414_v57  ;;  %2325 = vmatmul.mubr.msk.f32.vlgmr.msra.gmra.mrb[16].mxu0 %vm227_vm13, %v2414_v57 }
 0x7fd   :  { %1796 = vst.msk [vmem:[#allocation2 + $0xd] sm:$0x2] %vm449_vm15, %v2414_v57  ;;  %2333 = vmatpush3.msra.mxu0 %v2593_v43  ;;  %2334 = vmatprep.mubr.msk.f32.mxu0 %vm2478_vm1, %v2471_v2 }
 0x801   :  { %v2416_v40 = vpop.eup %2415 }
 0x802   :  { %v1946_v58 = vrot.slane %v2416_v40, 6 }
 0x804   :  { %2335 = vmatmul.mubr.msk.f32.vlgmr.msra.gmra.mrb[16].mxu0 %vm227_vm13, %v1946_v58 }
 0x8d7   :  { %v2015_v59 = vpop.f32.mrb[16].mxu0 }
 0x8d8   :  { %v2349_v60 = vadd.f32 %v2619_v50, %v2015_v59  ;;  %v2336_v61 = vpop.f32.mrb[17].mxu0 }
 0x8da   :  { %2417 = vtanh.f32 %v2349_v60 }
 0x8e4   :  { %v2418_v62 = vpop.eup %2417 }
 0x8e5   :  { %2020 = vst.msk [vmem:[#allocation2 + $0x7] sm:$0x1] %vm447_vm14, %v2418_v62 }
 0x8e6   :  { %2021 = vst.msk [vmem:[#allocation2 + $0xe] sm:$0x2] %vm449_vm15, %v2418_v62 }
 0x8ec   :  { %v2022_v2 = vld [vmem:[#allocation2] sm:$0xff] }
 0x8ed   :  { %v2023_v43 = vld [vmem:[#allocation2 + $0x8] sm:$0xff]  ;;  %2339 = vmatprep.mubr.msk.f32.mxu1 %vm227_vm13, %v2022_v2 }
 0x8ee   :  { %2340 = vmatmul.mubr.msk.f32.vlgmr.msra.gmra.mrb[16].mxu1 %vm227_vm13, %v2023_v43 }
 0x9c1   :  { %v2341_v0 = vpop.f32.mrb[16].mxu1 }
 0x9c2   :  { %v2110_v1 = vadd.f32 %v2341_v0, %v2155_v63  ;;  %v2104_v50 = vpop.f32.mrb[17].mxu1 }
 0x9c3   :  { %v2105_v3 = vadd.f32 %v2155_v63, %v2104_v50 }
 0x9c4   :  { %2114 = vst.msk [vmem:[%s2766_s8 + $0x8] sm:$0xff] %vm136_vm9, %v2110_v1 }
 0x9c5   :  { %2113 = vst.msk [vmem:[%s2766_s8] sm:$0xff] %vm136_vm9, %v2105_v3 }
 0x9c6   :  { %2119 = vsyncpa [#allocation4], 1 }
 0x9c7   :  { %2120 = vsyncpa [#allocation6], 1 }

</bundles_post_ra>
